<compile_context>
chip_gen: v7x
topology: tpu7x:2x2x1
jax: 0.10.0
libtpu: 0.0.40
codegen_flags: <defaults>
</compile_context>

<pallas_src>
import jax
import jax.numpy as jnp
from jax.experimental import pallas as pl
from jax.experimental.pallas import tpu as pltpu


def _round_up(n, m):
    return ((n + m - 1) // m) * m


def siamese_kernel(
    x_ref,                          # (2, TILE_B, 784) bf16 : [branch, batch, pixels]
    w1_ref, b1_ref,                 # (784, Hp) bf16, (1, Hp) f32   encoder layer 1
    w2_ref, b2_ref,                 # (Hp, E)   bf16, (1, E)  f32   encoder layer 2
    wr1a_ref, wr1b_ref, br1_ref,    # (E, Hp) bf16 x2, (1, Hp) f32  relation layer 1 (split concat)
    wr2_ref, br2_ref,               # (1, Hp) f32, (1, 1) f32       relation layer 2 (as row for VPU reduce)
    out_ref,                        # (TILE_B, 1) f32
):
    tb = x_ref.shape[1]

    # Stack both branches along rows -> one encoder pass with a full M dimension.
    x = jnp.concatenate([x_ref[0], x_ref[1]], axis=0)          # (2*TILE_B, 784) bf16

    # Shared feature extractor (MLP): Linear -> ReLU -> (Dropout=identity) -> Linear
    h = jnp.dot(x, w1_ref[...], preferred_element_type=jnp.float32) + b1_ref[...]
    h = jnp.maximum(h, 0.0).astype(w2_ref.dtype)
    e = jnp.dot(h, w2_ref[...], preferred_element_type=jnp.float32) + b2_ref[...]
    e = e.astype(wr1a_ref.dtype)

    e1 = e[:tb]                                                 # embedding1
    e2 = e[tb:]                                                 # embedding2

    # concat([e1, e2]) @ Wr1 == e1 @ Wr1[:E] + e2 @ Wr1[E:]  (avoids in-kernel concat along lanes)
    r = (
        jnp.dot(e1, wr1a_ref[...], preferred_element_type=jnp.float32)
        + jnp.dot(e2, wr1b_ref[...], preferred_element_type=jnp.float32)
        + br1_ref[...]
    )
    r = jnp.maximum(r, 0.0)
    # Dropout: identity at inference.

    # Final Linear(H, 1): VPU multiply + lane reduce instead of an N=1 MXU matmul.
    s = jnp.sum(r * wr2_ref[...], axis=-1, keepdims=True) + br2_ref[...]
    out_ref[...] = jax.nn.sigmoid(s)


def make_params(key, in_dim=784, hidden_dim=64, embedding_dim=128):
    """Deterministic PyTorch-Linear-style init: U(-1/sqrt(fan_in), 1/sqrt(fan_in))."""
    ks = jax.random.split(key, 8)

    def lin(kw, kb, fan_in, fan_out):
        bound = 1.0 / (fan_in ** 0.5)
        w = jax.random.uniform(kw, (fan_in, fan_out), jnp.float32, -bound, bound)
        b = jax.random.uniform(kb, (1, fan_out), jnp.float32, -bound, bound)
        return w, b

    w1, b1 = lin(ks[0], ks[1], in_dim, hidden_dim)                 # feature extractor layer 1
    w2, b2 = lin(ks[2], ks[3], hidden_dim, embedding_dim)          # feature extractor layer 2
    wr1, br1 = lin(ks[4], ks[5], 2 * embedding_dim, hidden_dim)    # relation head layer 1
    wr2, br2 = lin(ks[6], ks[7], hidden_dim, 1)                    # relation head layer 2
    return dict(w1=w1, b1=b1, w2=w2, b2=b2, wr1=wr1, br1=br1, wr2=wr2, br2=br2)


def pack_params(p, lane=128):
    """Pad hidden dim to a lane-dense 128, split the concat weight, cast MXU operands to bf16."""
    H = p["w1"].shape[1]
    E = p["w2"].shape[1]
    Hp = _round_up(H, lane)
    ph = Hp - H

    w1 = jnp.pad(p["w1"], ((0, 0), (0, ph))).astype(jnp.bfloat16)      # (784, Hp)
    b1 = jnp.pad(p["b1"], ((0, 0), (0, ph)))                           # (1, Hp) f32
    w2 = jnp.pad(p["w2"], ((0, ph), (0, 0))).astype(jnp.bfloat16)      # (Hp, E)
    b2 = p["b2"]                                                       # (1, E) f32

    wr1 = jnp.pad(p["wr1"], ((0, 0), (0, ph))).astype(jnp.bfloat16)    # (2E, Hp)
    wr1a = wr1[:E]                                                     # acts on embedding1
    wr1b = wr1[E:]                                                     # acts on embedding2
    br1 = jnp.pad(p["br1"], ((0, 0), (0, ph)))                         # (1, Hp) f32

    wr2_row = jnp.pad(p["wr2"].T, ((0, 0), (0, ph)))                   # (1, Hp) f32, zero-padded
    br2 = p["br2"]                                                     # (1, 1) f32

    return dict(w1=w1, b1=b1, w2=w2, b2=b2,
                wr1a=wr1a, wr1b=wr1b, br1=br1, wr2_row=wr2_row, br2=br2,
                Hp=Hp, E=E)


def siamese_forward(x, kp, *, tile_b=256):
    """x: (B, 2, 1, 28, 28) float32 -> relation_score: (B, 1) float32."""
    B = x.shape[0]
    D = x.shape[2] * x.shape[3] * x.shape[4]

    # One contiguous (2, B, D) bf16 stream: branch-major, batch second, pixels last.
    x_pairs = jnp.transpose(x.reshape(B, 2, D), (1, 0, 2)).astype(jnp.bfloat16)

    # Batch tile: multiple of 16 (bf16 sublane packing), capped at tile_b; pad B up.
    tb = min(tile_b, _round_up(B, 16))
    padded_B = _round_up(B, tb)
    if padded_B != B:
        x_pairs = jnp.pad(x_pairs, ((0, 0), (0, padded_B - B), (0, 0)))
    n_tiles = padded_B // tb

    Hp, E = kp["Hp"], kp["E"]
    const = lambda i: (0, 0)  # weights/biases stay VMEM-resident across grid steps

    out = pl.pallas_call(
        siamese_kernel,
        out_shape=jax.ShapeDtypeStruct((padded_B, 1), jnp.float32),
        grid=(n_tiles,),
        in_specs=[
            pl.BlockSpec((2, tb, D), lambda i: (0, i, 0)),   # paired images, tiled over batch
            pl.BlockSpec((D, Hp), const),                    # w1
            pl.BlockSpec((1, Hp), const),                    # b1
            pl.BlockSpec((Hp, E), const),                    # w2
            pl.BlockSpec((1, E), const),                     # b2
            pl.BlockSpec((E, Hp), const),                    # wr1a
            pl.BlockSpec((E, Hp), const),                    # wr1b
            pl.BlockSpec((1, Hp), const),                    # br1
            pl.BlockSpec((1, Hp), const),                    # wr2 (row)
            pl.BlockSpec((1, 1), const),                     # br2
        ],
        out_specs=pl.BlockSpec((tb, 1), lambda i: (i, 0)),
        compiler_params=pltpu.CompilerParams(
            dimension_semantics=("parallel",)),              # megacore sharding on v7x
    )(
        x_pairs,
        kp["w1"], kp["b1"], kp["w2"], kp["b2"],
        kp["wr1a"], kp["wr1b"], kp["br1"], kp["wr2_row"], kp["br2"],
    )
    return out[:B]


def siamese_ref(x, kp):
    """Pure-JAX reference mirroring the kernel's precision (bf16 operands, f32 accum)."""
    B = x.shape[0]
    xp = x.reshape(B, 2, -1).astype(jnp.bfloat16)
    x1, x2 = xp[:, 0], xp[:, 1]

    def encode(xi):
        h = jnp.dot(xi, kp["w1"], preferred_element_type=jnp.float32) + kp["b1"]
        h = jnp.maximum(h, 0.0).astype(jnp.bfloat16)
        e = jnp.dot(h, kp["w2"], preferred_element_type=jnp.float32) + kp["b2"]
        return e.astype(jnp.bfloat16)

    e1, e2 = encode(x1), encode(x2)
    r = (jnp.dot(e1, kp["wr1a"], preferred_element_type=jnp.float32)
         + jnp.dot(e2, kp["wr1b"], preferred_element_type=jnp.float32)
         + kp["br1"])
    r = jnp.maximum(r, 0.0)
    s = jnp.sum(r * kp["wr2_row"], axis=-1, keepdims=True) + kp["br2"]
    return jax.nn.sigmoid(s)


if __name__ == "__main__":
    key = jax.random.PRNGKey(0)
    k_x, k_p = jax.random.split(key)

    B = 16
    x = jax.random.normal(k_x, (B, 2, 1, 28, 28), dtype=jnp.float32)
    raw = make_params(k_p, in_dim=28 * 28, hidden_dim=64, embedding_dim=128)
    kp = pack_params(raw)

    out = siamese_forward(x, kp)
    out = jax.block_until_ready(out)

    ref = siamese_ref(x, kp)
    assert out.shape == (B, 1)
    assert jnp.allclose(out, ref, atol=1e-4, rtol=1e-4), "mismatch vs reference"

    print("KERNEL_OK")
</pallas_src>

<mosaic_0001>
module attributes {stable_mosaic.version = 11 : i64} {
  func.func @siamese_kernel(%arg0: i32, %arg1: memref<2x16x784xbf16, #tpu.memory_space<vmem>>, %arg2: memref<784x128xbf16, #tpu.memory_space<vmem>>, %arg3: memref<1x128xf32, #tpu.memory_space<vmem>>, %arg4: memref<128x128xbf16, #tpu.memory_space<vmem>>, %arg5: memref<1x128xf32, #tpu.memory_space<vmem>>, %arg6: memref<128x128xbf16, #tpu.memory_space<vmem>>, %arg7: memref<128x128xbf16, #tpu.memory_space<vmem>>, %arg8: memref<1x128xf32, #tpu.memory_space<vmem>>, %arg9: memref<1x128xf32, #tpu.memory_space<vmem>>, %arg10: memref<1x1xf32, #tpu.memory_space<vmem>>, %arg11: memref<16x1xf32, #tpu.memory_space<vmem>>) attributes {dimension_semantics = [#tpu.dimension_semantics<parallel>], iteration_bounds = array<i64: 1>, scalar_prefetch = 0 : i64, scratch_operands = 0 : i64, tpu.core_type = #tpu.core_type<tc>, window_params = [{transform_indices = @transform_0, window_bounds = array<i64: 2, 16, 784>}, {pipeline_mode = #tpu.pipeline_mode<synchronous>, transform_indices = @transform_1, window_bounds = array<i64: 784, 128>}, {pipeline_mode = #tpu.pipeline_mode<synchronous>, transform_indices = @transform_2, window_bounds = array<i64: 1, 128>}, {pipeline_mode = #tpu.pipeline_mode<synchronous>, transform_indices = @transform_3, window_bounds = array<i64: 128, 128>}, {pipeline_mode = #tpu.pipeline_mode<synchronous>, transform_indices = @transform_4, window_bounds = array<i64: 1, 128>}, {pipeline_mode = #tpu.pipeline_mode<synchronous>, transform_indices = @transform_5, window_bounds = array<i64: 128, 128>}, {pipeline_mode = #tpu.pipeline_mode<synchronous>, transform_indices = @transform_6, window_bounds = array<i64: 128, 128>}, {pipeline_mode = #tpu.pipeline_mode<synchronous>, transform_indices = @transform_7, window_bounds = array<i64: 1, 128>}, {pipeline_mode = #tpu.pipeline_mode<synchronous>, transform_indices = @transform_8, window_bounds = array<i64: 1, 128>}, {pipeline_mode = #tpu.pipeline_mode<synchronous>, transform_indices = @transform_9, window_bounds = array<i64: 1, 1>}, {transform_indices = @transform_10, window_bounds = array<i64: 16, 1>}]} {
    %c0 = arith.constant 0 : index
    %c0_0 = arith.constant 0 : index
    %c0_1 = arith.constant 0 : index
    %0 = vector.load %arg1[%c0, %c0_0, %c0_1] : memref<2x16x784xbf16, #tpu.memory_space<vmem>>, vector<1x16x784xbf16>
    %1 = vector.shape_cast %0 : vector<1x16x784xbf16> to vector<16x784xbf16>
    %c1 = arith.constant 1 : index
    %c0_2 = arith.constant 0 : index
    %c0_3 = arith.constant 0 : index
    %2 = vector.load %arg1[%c1, %c0_2, %c0_3] : memref<2x16x784xbf16, #tpu.memory_space<vmem>>, vector<1x16x784xbf16>
    %3 = vector.shape_cast %2 : vector<1x16x784xbf16> to vector<16x784xbf16>
    %4 = tpu.concatenate %1, %3 in 0 : vector<16x784xbf16>, vector<16x784xbf16> -> vector<32x784xbf16>
    %c0_4 = arith.constant 0 : index
    %c0_5 = arith.constant 0 : index
    %5 = vector.load %arg2[%c0_4, %c0_5] : memref<784x128xbf16, #tpu.memory_space<vmem>>, vector<784x128xbf16>
    %cst = arith.constant dense<0.000000e+00> : vector<32x128xf32>
    %6 = tpu.matmul %4, %5, %cst {dimension_numbers = #tpu.dot_dimension_numbers<[1], [0], [0], [1], [0, 0, 1, 1], [], []>} : vector<32x784xbf16>, vector<784x128xbf16>, vector<32x128xf32> -> vector<32x128xf32>
    %c0_6 = arith.constant 0 : index
    %c0_7 = arith.constant 0 : index
    %7 = vector.load %arg3[%c0_6, %c0_7] : memref<1x128xf32, #tpu.memory_space<vmem>>, vector<1x128xf32>
    %8 = vector.broadcast %7 : vector<1x128xf32> to vector<32x128xf32>
    %9 = arith.addf %6, %8 : vector<32x128xf32>
    %cst_8 = arith.constant 0.000000e+00 : f32
    %10 = vector.broadcast %cst_8 : f32 to vector<32x128xf32>
    %11 = arith.maximumf %9, %10 : vector<32x128xf32>
    %12 = arith.truncf %11 : vector<32x128xf32> to vector<32x128xbf16>
    %c0_9 = arith.constant 0 : index
    %c0_10 = arith.constant 0 : index
    %13 = vector.load %arg4[%c0_9, %c0_10] : memref<128x128xbf16, #tpu.memory_space<vmem>>, vector<128x128xbf16>
    %cst_11 = arith.constant dense<0.000000e+00> : vector<32x128xf32>
    %14 = tpu.matmul %12, %13, %cst_11 {dimension_numbers = #tpu.dot_dimension_numbers<[1], [0], [0], [1], [0, 0, 1, 1], [], []>} : vector<32x128xbf16>, vector<128x128xbf16>, vector<32x128xf32> -> vector<32x128xf32>
    %c0_12 = arith.constant 0 : index
    %c0_13 = arith.constant 0 : index
    %15 = vector.load %arg5[%c0_12, %c0_13] : memref<1x128xf32, #tpu.memory_space<vmem>>, vector<1x128xf32>
    %16 = vector.broadcast %15 : vector<1x128xf32> to vector<32x128xf32>
    %17 = arith.addf %14, %16 : vector<32x128xf32>
    %18 = arith.truncf %17 : vector<32x128xf32> to vector<32x128xbf16>
    %19 = vector.extract_strided_slice %18 {offsets = [0, 0], sizes = [16, 128], strides = [1, 1]} : vector<32x128xbf16> to vector<16x128xbf16>
    %20 = vector.extract_strided_slice %18 {offsets = [16, 0], sizes = [16, 128], strides = [1, 1]} : vector<32x128xbf16> to vector<16x128xbf16>
    %c0_14 = arith.constant 0 : index
    %c0_15 = arith.constant 0 : index
    %21 = vector.load %arg6[%c0_14, %c0_15] : memref<128x128xbf16, #tpu.memory_space<vmem>>, vector<128x128xbf16>
    %cst_16 = arith.constant dense<0.000000e+00> : vector<16x128xf32>
    %22 = tpu.matmul %19, %21, %cst_16 {dimension_numbers = #tpu.dot_dimension_numbers<[1], [0], [0], [1], [0, 0, 1, 1], [], []>} : vector<16x128xbf16>, vector<128x128xbf16>, vector<16x128xf32> -> vector<16x128xf32>
    %c0_17 = arith.constant 0 : index
    %c0_18 = arith.constant 0 : index
    %23 = vector.load %arg7[%c0_17, %c0_18] : memref<128x128xbf16, #tpu.memory_space<vmem>>, vector<128x128xbf16>
    %cst_19 = arith.constant dense<0.000000e+00> : vector<16x128xf32>
    %24 = tpu.matmul %20, %23, %cst_19 {dimension_numbers = #tpu.dot_dimension_numbers<[1], [0], [0], [1], [0, 0, 1, 1], [], []>} : vector<16x128xbf16>, vector<128x128xbf16>, vector<16x128xf32> -> vector<16x128xf32>
    %25 = arith.addf %22, %24 : vector<16x128xf32>
    %c0_20 = arith.constant 0 : index
    %c0_21 = arith.constant 0 : index
    %26 = vector.load %arg8[%c0_20, %c0_21] : memref<1x128xf32, #tpu.memory_space<vmem>>, vector<1x128xf32>
    %27 = vector.broadcast %26 : vector<1x128xf32> to vector<16x128xf32>
    %28 = arith.addf %25, %27 : vector<16x128xf32>
    %cst_22 = arith.constant 0.000000e+00 : f32
    %29 = vector.broadcast %cst_22 : f32 to vector<16x128xf32>
    %30 = arith.maximumf %28, %29 : vector<16x128xf32>
    %c0_23 = arith.constant 0 : index
    %c0_24 = arith.constant 0 : index
    %31 = vector.load %arg9[%c0_23, %c0_24] : memref<1x128xf32, #tpu.memory_space<vmem>>, vector<1x128xf32>
    %32 = vector.broadcast %31 : vector<1x128xf32> to vector<16x128xf32>
    %33 = arith.mulf %30, %32 : vector<16x128xf32>
    %cst_25 = arith.constant dense<0.000000e+00> : vector<16xf32>
    %34 = vector.multi_reduction <add>, %33, %cst_25 [1] : vector<16x128xf32> to vector<16xf32>
    %35 = vector.shape_cast %34 : vector<16xf32> to vector<16x1xf32>
    %c0_26 = arith.constant 0 : index
    %c0_27 = arith.constant 0 : index
    %36 = vector.load %arg10[%c0_26, %c0_27] : memref<1x1xf32, #tpu.memory_space<vmem>>, vector<1x1xf32>
    %37 = vector.broadcast %36 : vector<1x1xf32> to vector<16x1xf32>
    %38 = arith.addf %35, %37 : vector<16x1xf32>
    %39 = arith.negf %38 : vector<16x1xf32>
    %40 = math.exp %39 : vector<16x1xf32>
    %cst_28 = arith.constant 1.000000e+00 : f32
    %41 = vector.broadcast %cst_28 : f32 to vector<16x1xf32>
    %42 = arith.addf %41, %40 : vector<16x1xf32>
    %43 = arith.divf %41, %42 : vector<16x1xf32>
    %c0_29 = arith.constant 0 : index
    %c0_30 = arith.constant 0 : index
    %44 = vector.load %arg11[%c0_29, %c0_30] : memref<16x1xf32, #tpu.memory_space<vmem>>, vector<16x1xf32>
    tpu.vector_store %arg11[%c0_29, %c0_30], %43 {strides = array<i32>} : memref<16x1xf32, #tpu.memory_space<vmem>>, vector<16x1xf32>,
    return
  }
  func.func @transform_0(%arg0: i32) -> (i32, i32, i32) {
    %c0_i32 = arith.constant 0 : i32
    %c0_i32_0 = arith.constant 0 : i32
    %c0_i32_1 = arith.constant 0 : i32
    return %c0_i32, %arg0, %c0_i32_0 : i32, i32, i32
  }
  func.func @transform_1(%arg0: i32) -> (i32, i32) {
    %c0_i32 = arith.constant 0 : i32
    %c0_i32_0 = arith.constant 0 : i32
    %c0_i32_1 = arith.constant 0 : i32
    return %c0_i32, %c0_i32_0 : i32, i32
  }
  func.func @transform_2(%arg0: i32) -> (i32, i32) {
    %c0_i32 = arith.constant 0 : i32
    %c0_i32_0 = arith.constant 0 : i32
    %c0_i32_1 = arith.constant 0 : i32
    return %c0_i32, %c0_i32_0 : i32, i32
  }
  func.func @transform_3(%arg0: i32) -> (i32, i32) {
    %c0_i32 = arith.constant 0 : i32
    %c0_i32_0 = arith.constant 0 : i32
    %c0_i32_1 = arith.constant 0 : i32
    return %c0_i32, %c0_i32_0 : i32, i32
  }
  func.func @transform_4(%arg0: i32) -> (i32, i32) {
    %c0_i32 = arith.constant 0 : i32
    %c0_i32_0 = arith.constant 0 : i32
    %c0_i32_1 = arith.constant 0 : i32
    return %c0_i32, %c0_i32_0 : i32, i32
  }
  func.func @transform_5(%arg0: i32) -> (i32, i32) {
    %c0_i32 = arith.constant 0 : i32
    %c0_i32_0 = arith.constant 0 : i32
    %c0_i32_1 = arith.constant 0 : i32
    return %c0_i32, %c0_i32_0 : i32, i32
  }
  func.func @transform_6(%arg0: i32) -> (i32, i32) {
    %c0_i32 = arith.constant 0 : i32
    %c0_i32_0 = arith.constant 0 : i32
    %c0_i32_1 = arith.constant 0 : i32
    return %c0_i32, %c0_i32_0 : i32, i32
  }
  func.func @transform_7(%arg0: i32) -> (i32, i32) {
    %c0_i32 = arith.constant 0 : i32
    %c0_i32_0 = arith.constant 0 : i32
    %c0_i32_1 = arith.constant 0 : i32
    return %c0_i32, %c0_i32_0 : i32, i32
  }
  func.func @transform_8(%arg0: i32) -> (i32, i32) {
    %c0_i32 = arith.constant 0 : i32
    %c0_i32_0 = arith.constant 0 : i32
    %c0_i32_1 = arith.constant 0 : i32
    return %c0_i32, %c0_i32_0 : i32, i32
  }
  func.func @transform_9(%arg0: i32) -> (i32, i32) {
    %c0_i32 = arith.constant 0 : i32
    %c0_i32_0 = arith.constant 0 : i32
    %c0_i32_1 = arith.constant 0 : i32
    return %c0_i32, %c0_i32_0 : i32, i32
  }
  func.func @transform_10(%arg0: i32) -> (i32, i32) {
    %c0_i32 = arith.constant 0 : i32
    %c0_i32_0 = arith.constant 0 : i32
    return %arg0, %c0_i32 : i32, i32
  }
}

</mosaic_0001>

<bundles_post_ra>
// kernel: tpu_custom_call.1
= control target key start
LH: loop header
LB: loop body
LE: loop exit
PB: predicated region body
PF: predicated region fallthrough
CT: control target
= control target key end

     0   :  { %s1870_s0 = inlined_call_operand.hbm [shape: bf16[2,16,784], index: 0, kind: input, shape index: {}]   ;;  %s1871_s1 = inlined_call_operand.hbm [shape: bf16[784,128], index: 1, kind: input, shape index: {}]   ;;  %s1872_s2 = inlined_call_operand.vmem [shape: f32[1,128], index: 2, kind: input, shape index: {}]   ;;  %s1873_s3 = inlined_call_operand.hbm [shape: bf16[128,128], index: 3, kind: input, shape index: {}]   ;;  %s1874_s4 = inlined_call_operand.vmem [shape: f32[1,128], index: 4, kind: input, shape index: {}]   ;;  %s1875_s5 = inlined_call_operand.hbm [shape: bf16[128,128], index: 5, kind: input, shape index: {}]   ;;  %s1876_s6 = inlined_call_operand.hbm [shape: bf16[128,128], index: 6, kind: input, shape index: {}]   ;;  %s1877_s7 = inlined_call_operand.vmem [shape: f32[1,128], index: 7, kind: input, shape index: {}]   ;;  %s1878_s8 = inlined_call_operand.vmem [shape: f32[1,128], index: 8, kind: input, shape index: {}]   ;;  %s1879_s9 = inlined_call_operand.<no memory space> [shape: f32[1,1], index: 9, kind: input, shape index: {}]   ;;  %s1880_s10 = inlined_call_operand.vmem [shape: f32[16,1], index: 10, kind: output, shape index: {}]  }
   0x1   :  { %v15_v0 = vstv %s1879_s9 }
   0x2   :  { %16 = vst [vmem:[#allocation2] sm:$0x1] %v15_v0 }
   0x3   :  { %17 = vsyncpa [#allocation4], 0 }
   0x4   :  { %18 = vsyncpa [#allocation6], 0 }
   0x5   :  { %19 = vsyncpa [#allocation9], 0  ;;  %s1693_s15 = smov [#allocation5]   ;;  %s1577_s19 = scalar_lea.hbm %s1871_s1, 6272 }
   0x6   :  { %s37_s16 = sshll.u32 %s1693_s15, 4  ;;  %p1578_p0 = scmp.ne.s32.totalorder %s1871_s1, %s1577_s19  ;;  %s38_s16 = int_to_ptr.vmem [resolvable:$true] %s37_s16 }
   0x7   :  { %p1581_p1 = scmp.lt.u32.totalorder %s1577_s19, %s1871_s1 }
   0x9   :  { %p1583_p2 = pnand %p1581_p1, %p1578_p0 }
   0xb   :  { %1586 = shalt.err (!%p1583_p2)
}
   0xc   :  { %s1587_s9 = scalar_lea.vmem %s38_s16, 6272  ;;  %p1592_p4 = scmp.lt.s32.totalorder %s38_s16, %s38_s16 }
   0xd   :  { %p1588_p3 = scmp.ne.s32.totalorder %s38_s16, %s1587_s9  ;;  %p1593_p5 = scmp.lt.s32.totalorder %s1587_s9, %s1587_s9 }
   0xf   :  { %p1594_p6 = por %p1593_p5, %p1592_p4 }
  0x11   :  { %p1595_p7 = pnand %p1594_p6, %p1588_p3 }
  0x13   :  { %1598 = shalt.err (!%p1595_p7)
}
  0x14   :  { %s1694_s24 = smov 64   ;;  %s1695_s25 = smov 4  }
  0x15   :  { %43 = dma.hbm_to_vmem [thread:$0]  %s1871_s1, 6272, %s38_s16, [#allocation6], %s1694_s24, %s1694_s24, %s1695_s25  }
  0x16   :  { %s1696_s28 = smov [#allocation8]   ;;  %s1697_s30 = smov [#allocation3]  }
  0x17   :  { %s65_s29 = sshll.u32 %s1696_s28, 4  ;;  %s25_s11 = sshll.u32 %s1697_s30, 4  ;;  %s66_s29 = int_to_ptr.vmem [resolvable:$true] %s65_s29  ;;  %s26_s11 = int_to_ptr.vmem [resolvable:$true] %s25_s11 }
  0x18   :  { %s1599_s14 = scalar_lea.hbm %s1875_s5, 1024 }
  0x19   :  { %p1600_p8 = scmp.ne.s32.totalorder %s1875_s5, %s1599_s14  ;;  %p1603_p9 = scmp.lt.u32.totalorder %s1599_s14, %s1875_s5 }
  0x1b   :  { %p1605_p10 = pnand %p1603_p9, %p1600_p8 }
  0x1d   :  { %1608 = shalt.err (!%p1605_p10)
}
  0x1e   :  { %s1609_s1 = scalar_lea.vmem %s66_s29, 1024  ;;  %p1614_p12 = scmp.lt.s32.totalorder %s66_s29, %s66_s29 }
  0x1f   :  { %p1610_p11 = scmp.ne.s32.totalorder %s66_s29, %s1609_s1  ;;  %p1615_p13 = scmp.lt.s32.totalorder %s1609_s1, %s1609_s1 }
  0x21   :  { %p1616_p0 = por %p1615_p13, %p1614_p12 }
  0x23   :  { %p1617_p1 = pnand %p1616_p0, %p1610_p11 }
  0x25   :  { %1620 = shalt.err (!%p1617_p1)
}
  0x26   :  { %71 = dma.hbm_to_vmem [thread:$0]  %s1875_s5, 1024, %s66_s29, [#allocation9], %s1694_s24, %s1694_s24, %s1695_s25  }
  0x27   :  { %s1621_s23 = scalar_lea.hbm %s1870_s0, 1792 }
  0x28   :  { %p1622_p2 = scmp.ne.s32.totalorder %s1870_s0, %s1621_s23  ;;  %p1625_p3 = scmp.lt.u32.totalorder %s1621_s23, %s1870_s0 }
  0x2a   :  { %p1627_p4 = pnand %p1625_p3, %p1622_p2 }
  0x2c   :  { %1630 = shalt.err (!%p1627_p4)
}
  0x2d   :  { %s1631_s30 = scalar_lea.vmem %s26_s11, 1792  ;;  %p1636_p6 = scmp.lt.s32.totalorder %s26_s11, %s26_s11 }
  0x2e   :  { %p1632_p5 = scmp.ne.s32.totalorder %s26_s11, %s1631_s30  ;;  %p1637_p7 = scmp.lt.s32.totalorder %s1631_s30, %s1631_s30 }
  0x30   :  { %p1638_p8 = por %p1637_p7, %p1636_p6 }
  0x32   :  { %p1639_p9 = pnand %p1638_p8, %p1632_p5 }
  0x34   :  { %1642 = shalt.err (!%p1639_p9)
}
  0x35   :  { %s1698_s5 = smov 448   ;;  %s1699_s29 = smov 28  }
  0x36   :  { %31 = dma.hbm_to_vmem [thread:$0]  %s1870_s0, 1792, %s26_s11, [#allocation4], %s1698_s5, %s1698_s5, %s1699_s29  }
  0x37   :  { %s1700_s14 = smov [#allocation7]   ;;  %s1701_s17 = smov [#allocation10]  }
  0x38   :  { %s51_s15 = sshll.u32 %s1700_s14, 4  ;;  %s77_s18 = sshll.u32 %s1701_s17, 4  ;;  %s52_s15 = int_to_ptr.vmem [resolvable:$true] %s51_s15  ;;  %s78_s18 = int_to_ptr.vmem [resolvable:$true] %s77_s18 }
  0x39   :  { %s1643_s16 = scalar_lea.hbm %s1873_s3, 1024 }
  0x3a   :  { %p1644_p10 = scmp.ne.s32.totalorder %s1873_s3, %s1643_s16  ;;  %p1647_p11 = scmp.lt.u32.totalorder %s1643_s16, %s1873_s3 }
  0x3c   :  { %p1649_p12 = pnand %p1647_p11, %p1644_p10 }
  0x3e   :  { %1652 = shalt.err (!%p1649_p12)
}
  0x3f   :  { %s1653_s0 = scalar_lea.vmem %s52_s15, 1024  ;;  %p1658_p0 = scmp.lt.s32.totalorder %s52_s15, %s52_s15 }
  0x40   :  { %p1654_p13 = scmp.ne.s32.totalorder %s52_s15, %s1653_s0  ;;  %p1659_p1 = scmp.lt.s32.totalorder %s1653_s0, %s1653_s0 }
  0x42   :  { %p1660_p2 = por %p1659_p1, %p1658_p0 }
  0x44   :  { %p1661_p3 = pnand %p1660_p2, %p1654_p13 }
  0x46   :  { %1664 = shalt.err (!%p1661_p3)
}
  0x47   :  { %57 = dma.hbm_to_vmem [thread:$0]  %s1873_s3, 1024, %s52_s15, [#allocation6], %s1694_s24, %s1694_s24, %s1695_s25  }
  0x48   :  { %s1665_s28 = scalar_lea.hbm %s1876_s6, 1024 }
  0x49   :  { %p1666_p4 = scmp.ne.s32.totalorder %s1876_s6, %s1665_s28  ;;  %p1669_p5 = scmp.lt.u32.totalorder %s1665_s28, %s1876_s6 }
  0x4b   :  { %p1671_p6 = pnand %p1669_p5, %p1666_p4 }
  0x4d   :  { %1674 = shalt.err (!%p1671_p6)
}
  0x4e   :  { %s1675_s13 = scalar_lea.vmem %s78_s18, 1024  ;;  %p1680_p8 = scmp.lt.s32.totalorder %s78_s18, %s78_s18 }
  0x4f   :  { %p1676_p7 = scmp.ne.s32.totalorder %s78_s18, %s1675_s13  ;;  %p1681_p9 = scmp.lt.s32.totalorder %s1675_s13, %s1675_s13 }
  0x51   :  { %p1682_p10 = por %p1681_p9, %p1680_p8 }
  0x53   :  { %p1683_p11 = pnand %p1682_p10, %p1676_p7 }
  0x55   :  { %1686 = shalt.err (!%p1683_p11)
}
  0x56   :  { %83 = dma.hbm_to_vmem [thread:$0]  %s1876_s6, 1024, %s78_s18, [#allocation9], %s1694_s24, %s1694_s24, %s1695_s25  }
  0x57   :  { %1687 = dma.done.wait [#allocation4], 1792  }
  0x58   :  { %1688 = vsyncadd [#allocation4], 4294965504 }
  0x59   :  { %1689 = dma.done.wait [#allocation6], 7296  }
  0x5a   :  { %1690 = vsyncadd [#allocation6], 4294960000 }
  0x5b   :  { %1691 = dma.done.wait [#allocation9], 2048  }
  0x5c   :  { %1692 = vsyncadd [#allocation9], 4294965248  ;;  %v1476_v1 = vld [vmem:[#allocation5 + $0x40] sm:$0xff]   ;;  %v1480_v5 = vld [vmem:[#allocation5 + $0x48] sm:$0xff]   ;;  %vm592_vm0 = vcmask 130048   ;;  %vm1703_vm1 = vmmov 0  }
  0x5d   :  { %v1477_v2 = vld [vmem:[#allocation5] sm:$0xff]   ;;  %1284 = vmatprep.subr.bf16.mxu0 %v1476_v1  ;;  %v1481_v6 = vld [vmem:[#allocation5 + $0x8] sm:$0xff]   ;;  %v1484_v9 = vld [vmem:[#allocation5 + $0x50] sm:$0xff]   ;;  %vm1178_vm2 = vcmask 7168  }
  0x5e   :  { %v1478_v3 = vld [vmem:[#allocation5 + $0xc0] sm:$0xff]   ;;  %1285 = vmatpush3.bf16.msra.mxu0 %v1477_v2  ;;  %v1482_v7 = vld [vmem:[#allocation5 + $0xc8] sm:$0xff]   ;;  %v1485_v10 = vld [vmem:[#allocation5 + $0x10] sm:$0xff]  }
  0x5f   :  { %v1479_v4 = vld [vmem:[#allocation5 + $0x80] sm:$0xff]   ;;  %1312 = vmatprep.subr.bf16.mxu1 %v1478_v3  ;;  %1286 = vmatprep.subr.bf16.mxu0 %v1480_v5  ;;  %v1483_v8 = vld [vmem:[#allocation5 + $0x88] sm:$0xff]   ;;  %v1486_v11 = vld [vmem:[#allocation5 + $0xd0] sm:$0xff]  }
  0x60   :  { %1313 = vmatpush3.bf16.msra.mxu1 %v1479_v4  ;;  %v1487_v12 = vld [vmem:[#allocation5 + $0x90] sm:$0xff]   ;;  %v1488_v13 = vld [vmem:[#allocation5 + $0x58] sm:$0xff]   ;;  %v1492_v17 = vld [vmem:[#allocation5 + $0x60] sm:$0xff]  }
  0x61   :  { %1314 = vmatprep.subr.bf16.mxu1 %v1482_v7  ;;  %v1489_v14 = vld [vmem:[#allocation5 + $0x18] sm:$0xff]   ;;  %v1493_v18 = vld [vmem:[#allocation5 + $0x20] sm:$0xff]   ;;  %v1496_v21 = vld [vmem:[#allocation5 + $0x68] sm:$0xff]  }
  0x62   :  { %1287 = vmatpush3.bf16.msra.mxu0 %v1481_v6  ;;  %v1490_v15 = vld [vmem:[#allocation5 + $0xd8] sm:$0xff]   ;;  %v1494_v19 = vld [vmem:[#allocation5 + $0xe0] sm:$0xff]   ;;  %v1497_v22 = vld [vmem:[#allocation5 + $0x28] sm:$0xff]  }
  0x63   :  { %1288 = vmatprep.subr.bf16.mxu0 %v1484_v9  ;;  %v1491_v16 = vld [vmem:[#allocation5 + $0x98] sm:$0xff]   ;;  %v1495_v20 = vld [vmem:[#allocation5 + $0xa0] sm:$0xff]   ;;  %v1498_v23 = vld [vmem:[#allocation5 + $0xe8] sm:$0xff]   ;;  %v1702_v9 = vmov 0.0  }
  0x64   :  { %1315 = vmatpush3.bf16.msra.mxu1 %v1483_v8  ;;  %v1499_v24 = vld [vmem:[#allocation5 + $0xa8] sm:$0xff]   ;;  %v1500_v25 = vld [vmem:[#allocation5 + $0x70] sm:$0xff]   ;;  %v1504_v29 = vld [vmem:[#allocation5 + $0x78] sm:$0xff]  }
  0x65   :  { %1316 = vmatprep.subr.bf16.mxu1 %v1486_v11  ;;  %v1501_v26 = vld [vmem:[#allocation5 + $0x30] sm:$0xff]   ;;  %v1505_v30 = vld [vmem:[#allocation5 + $0x38] sm:$0xff]   ;;  %v1511_v35 = vld [vmem:[#allocation5 + $0x140] sm:$0xff]  }
  0x66   :  { %1289 = vmatpush3.bf16.msra.mxu0 %v1485_v10  ;;  %v1502_v27 = vld [vmem:[#allocation5 + $0xf0] sm:$0xff]   ;;  %v1506_v31 = vld [vmem:[#allocation5 + $0xf8] sm:$0xff]   ;;  %v1515_v38 = vld [vmem:[#allocation5 + $0x100] sm:$0xff]  }
  0x67   :  { %1290 = vmatprep.subr.bf16.mxu0 %v1488_v13  ;;  %v1503_v28 = vld [vmem:[#allocation5 + $0xb0] sm:$0xff]   ;;  %v1510_v34 = vld [vmem:[#allocation5 + $0xb8] sm:$0xff]   ;;  %v1516_v39 = vld [vmem:[#allocation5 + $0x148] sm:$0xff]  }
  0x68   :  { %1317 = vmatpush3.bf16.msra.mxu1 %v1487_v12  ;;  %v1507_v32 = vld [vmem:[#allocation3] ss:$28 sps:$4 sm:$0xff]   ;;  %v1512_v36 = vld [vmem:[#allocation3 + $0x8] ss:$28 sps:$4 sm:$0xff]   ;;  %v1527_v46 = vld [vmem:[#allocation3 + $0x38] ss:$28 sps:$4 sm:$0xff]  }
  0x69   :  { %1318 = vmatprep.subr.bf16.mxu1 %v1490_v15  ;;  %v1509_v33 = vld [vmem:[#allocation3 + $0x4] ss:$28 sps:$4 sm:$0xff]   ;;  %v1514_v37 = vld [vmem:[#allocation3 + $0xc] ss:$28 sps:$4 sm:$0xff]   ;;  %v1517_v40 = vld [vmem:[#allocation5 + $0x108] sm:$0xff]  }
  0x6a   :  { %1291 = vmatpush3.bf16.msra.mxu0 %v1489_v14  ;;  %631 = vmatprep.mubr.bf16.mxu0 %v1509_v33  ;;  %v1518_v41 = vld [vmem:[#allocation5 + $0x150] sm:$0xff]   ;;  %v1520_v43 = vld [vmem:[#allocation5 + $0x158] sm:$0xff]   ;;  %v1524_v44 = vld [vmem:[#allocation3 + $0x3c] ss:$28 sps:$4 sm:$0xff]  }
  0x6b   :  { %1292 = vmatprep.subr.bf16.mxu0 %v1492_v17  ;;  %680 = vmatprep.mubr.bf16.mxu1 %v1514_v37  ;;  %v1519_v42 = vld [vmem:[#allocation5 + $0x110] sm:$0xff]   ;;  %v1521_v45 = vld [vmem:[#allocation5 + $0x118] sm:$0xff]   ;;  %v1522_v47 = vld [vmem:[#allocation5 + $0x160] sm:$0xff]  }
  0x6c   :  { %1319 = vmatpush3.bf16.msra.mxu1 %v1491_v16  ;;  %v1529_v48 = vld [vmem:[#allocation3 + $0x44] ss:$28 sps:$4 sm:$0xff]   ;;  %v1523_v50 = vld [vmem:[#allocation5 + $0x120] sm:$0xff]   ;;  %v1526_v51 = vld [vmem:[#allocation5 + $0x168] sm:$0xff]  }
  0x6d   :  { %1320 = vmatprep.subr.bf16.mxu1 %v1494_v19  ;;  %v1531_v49 = vld [vmem:[#allocation3 + $0x40] ss:$28 sps:$4 sm:$0xff]   ;;  %v1534_v52 = vld [vmem:[#allocation5 + $0x180] sm:$0xff]   ;;  %v1535_v59 = vld [vmem:[#allocation5 + $0x178] sm:$0xff]  }
  0x6e   :  { %1293 = vmatpush3.bf16.msra.mxu0 %v1493_v18  ;;  %v1528_v53 = vld [vmem:[#allocation5 + $0x128] sm:$0xff]   ;;  %v1532_v54 = vld [vmem:[#allocation5 + $0x170] sm:$0xff]   ;;  %v1539_v55 = vld [vmem:[#allocation3 + $0x14] ss:$28 sps:$4 sm:$0xff]  }
  0x6f   :  { %1294 = vmatprep.subr.bf16.mxu0 %v1496_v21  ;;  %v1540_v56 = vld [vmem:[#allocation3 + $0x18] ss:$28 sps:$4 sm:$0xff]   ;;  %v1541_v57 = vld [vmem:[#allocation3 + $0x50] ss:$28 sps:$4 sm:$0xff]   ;;  %v1533_v58 = vld [vmem:[#allocation5 + $0x130] sm:$0xff]  }
  0x70   :  { %1321 = vmatpush3.bf16.msra.mxu1 %v1495_v20  ;;  %v1536_v60 = vld [vmem:[#allocation5 + $0x138] sm:$0xff]   ;;  %v1545_v0 = vld [vmem:[#allocation7] sm:$0xff]   ;;  %v1546_v1 = vld [vmem:[#allocation7 + $0x8] sm:$0xff]  }
  0x71   :  { %1322 = vmatprep.subr.bf16.mxu1 %v1498_v23  ;;  %v1537_v61 = vld [vmem:[#allocation3 + $0x10] ss:$28 sps:$4 sm:$0xff]   ;;  %v1544_v63 = vld [vmem:[#allocation3 + $0x48] ss:$28 sps:$4 sm:$0xff]   ;;  %v1549_v4 = vld [vmem:[#allocation7 + $0x20] sm:$0xff]  }
  0x72   :  { %1295 = vmatpush3.bf16.msra.mxu0 %v1497_v22  ;;  %v1542_v62 = vld [vmem:[#allocation3 + $0x4c] ss:$28 sps:$4 sm:$0xff]   ;;  %v1548_v3 = vld [vmem:[#allocation7 + $0x18] sm:$0xff]   ;;  %v1550_v5 = vld [vmem:[#allocation7 + $0x28] sm:$0xff]  }
  0x73   :  { %1296 = vmatprep.subr.bf16.mxu0 %v1500_v25  ;;  %v1547_v2 = vld [vmem:[#allocation7 + $0x10] sm:$0xff]   ;;  %v1552_v7 = vld [vmem:[#allocation7 + $0x38] sm:$0xff]   ;;  %v1553_v8 = vld [vmem:[#allocation10] sm:$0xff]  }
  0x74   :  { %1323 = vmatpush3.bf16.msra.mxu1 %v1499_v24  ;;  %v1551_v6 = vld [vmem:[#allocation7 + $0x30] sm:$0xff]   ;;  %v1555_v10 = vld [vmem:[#allocation10 + $0x8] sm:$0xff]   ;;  %v1559_v12 = vld [vmem:[#allocation10 + $0x18] sm:$0xff]  }
  0x75   :  { %1324 = vmatprep.subr.bf16.mxu1 %v1502_v27  ;;  %v1557_v11 = vld [vmem:[#allocation10 + $0x10] sm:$0xff]   ;;  %v1561_v13 = vld [vmem:[#allocation10 + $0x20] sm:$0xff]   ;;  %v1563_v14 = vld [vmem:[#allocation10 + $0x28] sm:$0xff]  }
  0x76   :  { %1297 = vmatpush3.bf16.msra.mxu0 %v1501_v26  ;;  %v1202_v16 = vld [vmem:[%s1872_s2] ss:$0 sm:$0xff] }
  0x77   :  { %1298 = vmatprep.subr.bf16.mxu0 %v1504_v29 }
  0x78   :  { %1325 = vmatpush3.bf16.msra.mxu1 %v1503_v28 }
  0x79   :  { %1326 = vmatprep.subr.bf16.mxu1 %v1506_v31 }
  0x7a   :  { %1299 = vmatpush3.bf16.msra.mxu0 %v1505_v30 }
  0x7b   :  { %1340 = vmatprep.subr.bf16.mxu0 %v1511_v35 }
  0x7c   :  { %1327 = vmatpush3.bf16.msra.mxu1 %v1510_v34 }
  0x7d   :  { %632 = vmatmul.mubr.bf16.vlgmr.msra.gmra.mrb[0].mxu0 %v1507_v32  ;;  %1399 = vmatprep.subr.bf16.mxu1 %v1534_v52 }
  0x7e   :  { %1341 = vmatpush3.bf16.msra.mxu0 %v1515_v38  ;;  %639 = vmatprep.mubr.bf16.mxu0 %v1524_v44 }
  0x7f   :  { %681 = vmatmul.mubr.bf16.vlgmr.msra.gmra.mrb[0].mxu1 %v1512_v36  ;;  %1342 = vmatprep.subr.bf16.mxu0 %v1516_v39 }
  0x80   :  { %688 = vmatprep.mubr.bf16.mxu1 %v1529_v48  ;;  %1400 = vmatpush3.bf16.msra.mxu1 %v1534_v52 }
  0x81   :  { %1405 = vmatprep.subr.bf16.mxu1 %v1545_v0 }
  0x82   :  { %1343 = vmatpush3.bf16.msra.mxu0 %v1517_v40 }
  0x83   :  { %1344 = vmatprep.subr.bf16.mxu0 %v1518_v41 }
  0x85   :  { %640 = vmatmul.mubr.bf16.gmra.mrb[4].mxu0 %v1527_v46 }
  0x86   :  { %1345 = vmatpush3.bf16.msra.mxu0 %v1519_v42  ;;  %729 = vmatprep.mubr.bf16.mxu0 %v1539_v55 }
  0x87   :  { %1346 = vmatprep.subr.bf16.mxu0 %v1520_v43  ;;  %689 = vmatmul.mubr.bf16.gmra.mrb[4].mxu1 %v1531_v49 }
  0x88   :  { %1401 = vmatprep.mubr.msk.bf16.mxu1 %vm592_vm0, %v1540_v56 }
  0x8a   :  { %1347 = vmatpush3.bf16.msra.mxu0 %v1521_v45 }
  0x8b   :  { %1348 = vmatprep.subr.bf16.mxu0 %v1522_v47 }
  0x8e   :  { %1349 = vmatpush3.bf16.msra.mxu0 %v1523_v50 }
  0x8f   :  { %1350 = vmatprep.subr.bf16.mxu0 %v1526_v51  ;;  %1402 = vmatmul.mubr.msk.bf16.vlgmr.msra.gmra.mrb[8].mxu1 %vm592_vm0, %v1541_v57 }
  0x90   :  { %1406 = vmatpush3.bf16.msra.mxu1 %v1545_v0 }
  0x91   :  { %1407 = vmatprep.subr.bf16.mxu1 %v1546_v1 }
  0x92   :  { %1351 = vmatpush3.bf16.msra.mxu0 %v1528_v53 }
  0x93   :  { %1352 = vmatprep.subr.bf16.mxu0 %v1532_v54 }
  0x94   :  { %1408 = vmatpush3.bf16.msra.mxu1 %v1546_v1 }
  0x95   :  { %1409 = vmatprep.subr.bf16.mxu1 %v1547_v2 }
  0x96   :  { %1353 = vmatpush3.bf16.msra.mxu0 %v1533_v58 }
  0x97   :  { %1354 = vmatprep.subr.bf16.mxu0 %v1535_v59 }
  0x98   :  { %1410 = vmatpush3.bf16.msra.mxu1 %v1547_v2 }
  0x99   :  { %1411 = vmatprep.subr.bf16.mxu1 %v1548_v3 }
  0x9a   :  { %1355 = vmatpush3.bf16.msra.mxu0 %v1536_v60 }
  0x9b   :  { %1425 = vmatprep.subr.bf16.mxu0 %v1702_v9 }
  0x9c   :  { %1412 = vmatpush3.bf16.msra.mxu1 %v1548_v3 }
  0x9d   :  { %730 = vmatmul.mubr.bf16.vlgmr.msra.gmra.mrb[8].mxu0 %v1537_v61  ;;  %1413 = vmatprep.subr.bf16.mxu1 %v1549_v4 }
  0x9e   :  { %737 = vmatprep.mubr.bf16.mxu0 %v1542_v62  ;;  %1426 = vmatpush3.bf16.msra.mxu0 %v1553_v8 }
  0x9f   :  { %1427 = vmatprep.subr.bf16.mxu0 %v1702_v9 }
  0xa0   :  { %1414 = vmatpush3.bf16.msra.mxu1 %v1549_v4 }
  0xa1   :  { %1415 = vmatprep.subr.bf16.mxu1 %v1550_v5 }
  0xa2   :  { %1428 = vmatpush3.bf16.msra.mxu0 %v1555_v10 }
  0xa3   :  { %1429 = vmatprep.subr.bf16.mxu0 %v1702_v9 }
  0xa4   :  { %1416 = vmatpush3.bf16.msra.mxu1 %v1550_v5 }
  0xa5   :  { %738 = vmatmul.mubr.bf16.gmra.mrb[12].mxu0 %v1544_v63  ;;  %1417 = vmatprep.subr.bf16.mxu1 %v1551_v6 }
  0xa6   :  { %1430 = vmatpush3.bf16.msra.mxu0 %v1557_v11  ;;  %1441 = vmatprep.mubr.msk.bf16.mxu0 %vm1703_vm1, %v1702_v9 }
  0xa7   :  { %1431 = vmatprep.subr.bf16.mxu0 %v1702_v9 }
  0xa8   :  { %1418 = vmatpush3.bf16.msra.mxu1 %v1551_v6 }
  0xa9   :  { %1419 = vmatprep.subr.bf16.mxu1 %v1552_v7 }
  0xaa   :  { %1432 = vmatpush3.bf16.msra.mxu0 %v1559_v12 }
  0xab   :  { %1433 = vmatprep.subr.bf16.mxu0 %v1702_v9 }
  0xac   :  { %1420 = vmatpush3.bf16.msra.mxu1 %v1552_v7 }
  0xad   :  { %1445 = vmatprep.subr.bf16.mxu1 %v1702_v9 }
  0xae   :  { %1434 = vmatpush3.bf16.msra.mxu0 %v1561_v13 }
  0xaf   :  { %1435 = vmatprep.subr.bf16.mxu0 %v1702_v9 }
  0xb2   :  { %1436 = vmatpush3.bf16.msra.mxu0 %v1563_v14  ;;  %v1554_v14 = vld [vmem:[#allocation8] sm:$0xff]  }
  0xb3   :  { %1437 = vmatprep.subr.bf16.mxu0 %v1702_v9 }
 0x150   :  { %v1300_v15 = vpop.f32.mrb[0].mxu0 }
 0x151   :  { %v1301_v17 = vpop.f32.mrb[1].mxu0 }
 0x152   :  { %v1302_v18 = vadd.f32 %v1301_v17, %v1300_v15  ;;  %v1303_v19 = vpop.f32.mrb[2].mxu0  ;;  %v1328_v20 = vpop.f32.mrb[0].mxu1  ;;  %v1558_v17 = vld [vmem:[#allocation8 + $0x10] sm:$0xff]  }
 0x153   :  { %v1304_v21 = vpop.f32.mrb[3].mxu0  ;;  %v1329_v24 = vpop.f32.mrb[1].mxu1 }
 0x154   :  { %v634_v22 = vadd.f32 %v1302_v18, %v1202_v16  ;;  %v1305_v23 = vadd.f32 %v1304_v21, %v1303_v19  ;;  %v1330_v25 = vadd.f32 %v1329_v24, %v1328_v20  ;;  %v1331_v26 = vpop.f32.mrb[2].mxu1  ;;  %v1560_v18 = vld [vmem:[#allocation8 + $0x18] sm:$0xff]   ;;  %v1562_v19 = vld [vmem:[#allocation8 + $0x20] sm:$0xff]   ;;  %v1564_v20 = vld [vmem:[#allocation8 + $0x28] sm:$0xff]  }
 0x155   :  { %v1332_v28 = vpop.f32.mrb[3].mxu1  ;;  %v1565_v21 = vld [vmem:[#allocation10 + $0x30] sm:$0xff]   ;;  %v1568_v24 = vld [vmem:[#allocation8 + $0x38] sm:$0xff]  }
 0x156   :  { %v637_v27 = vadd.f32 %v1305_v23, %v1202_v16  ;;  %v683_v29 = vadd.f32 %v1330_v25, %v634_v22  ;;  %v1333_v30 = vadd.f32 %v1332_v28, %v1331_v26  ;;  %v1566_v22 = vld [vmem:[#allocation8 + $0x30] sm:$0xff]   ;;  %1438 = vmatpush3.bf16.msra.mxu0 %v1565_v21  ;;  %v1567_v23 = vld [vmem:[#allocation10 + $0x38] sm:$0xff]   ;;  %v1254_v26 = vld [vmem:[%s1874_s4] ss:$0 sm:$0xff] }
 0x157   :  { %1439 = vmatprep.subr.bf16.mxu0 %v1702_v9 }
 0x158   :  { %v686_v31 = vadd.f32 %v1333_v30, %v637_v27  ;;  %v1306_v32 = vpop.f32.mrb[4].mxu0 }
 0x159   :  { %v1307_v33 = vpop.f32.mrb[5].mxu0 }
 0x15a   :  { %v1308_v34 = vadd.f32 %v1307_v33, %v1306_v32  ;;  %v1309_v35 = vpop.f32.mrb[6].mxu0  ;;  %v1334_v36 = vpop.f32.mrb[4].mxu1  ;;  %1440 = vmatpush3.bf16.msra.mxu0 %v1567_v23 }
 0x15b   :  { %v1310_v37 = vpop.f32.mrb[7].mxu0  ;;  %v1335_v40 = vpop.f32.mrb[5].mxu1 }
 0x15c   :  { %v642_v38 = vadd.f32 %v1308_v34, %v1202_v16  ;;  %v1311_v39 = vadd.f32 %v1310_v37, %v1309_v35  ;;  %v1336_v41 = vadd.f32 %v1335_v40, %v1334_v36  ;;  %v1337_v42 = vpop.f32.mrb[6].mxu1 }
 0x15d   :  { %v1338_v44 = vpop.f32.mrb[7].mxu1 }
 0x15e   :  { %v645_v43 = vadd.f32 %v1311_v39, %v1202_v16  ;;  %v691_v45 = vadd.f32 %v1336_v41, %v642_v38  ;;  %v1339_v46 = vadd.f32 %v1338_v44, %v1337_v42  ;;  %v1556_v16 = vld [vmem:[#allocation8 + $0x8] sm:$0xff]  }
 0x160   :  { %v694_v47 = vadd.f32 %v1339_v46, %v645_v43 }
 0x162   :  { %v1403_v48 = vpop.f32.mrb[8].mxu1 }
 0x163   :  { %v780_v49 = vpop.f32.mrb[9].mxu1 }
 0x164   :  { %v1404_v50 = vpop.f32.mrb[10].mxu1 }
 0x165   :  { %v783_v51 = vpop.f32.mrb[11].mxu1 }
 0x170   :  { %v1356_v52 = vpop.f32.mrb[8].mxu0 }
 0x171   :  { %v1357_v53 = vpop.f32.mrb[9].mxu0 }
 0x172   :  { %v1358_v54 = vadd.f32 %v1357_v53, %v1356_v52  ;;  %v1359_v55 = vpop.f32.mrb[10].mxu0  ;;  %v1281_v53 = vld [vmem:[#allocation2] ss:$0 sm:$0xff] }
 0x173   :  { %v1360_v56 = vpop.f32.mrb[11].mxu0 }
 0x174   :  { %v1361_v57 = vadd.f32 %v1360_v56, %v1359_v55  ;;  %v732_v58 = vadd.f32 %v1358_v54, %v683_v29 }
 0x176   :  { %v781_v59 = vadd.f32 %v780_v49, %v732_v58  ;;  %v735_v60 = vadd.f32 %v1361_v57, %v686_v31 }
 0x178   :  { %v784_v61 = vadd.f32 %v783_v51, %v735_v60  ;;  %v1362_v62 = vpop.f32.mrb[12].mxu0  ;;  %v795_v0 = vmax.f32 %v781_v59, 0.0 }
 0x179   :  { %v1363_v63 = vpop.f32.mrb[13].mxu0 }
 0x17a   :  { %v796_v1 = vmax.f32 %v784_v61, 0.0  ;;  %v1364_v2 = vadd.f32 %v1363_v63, %v1362_v62  ;;  %v1365_v3 = vpop.f32.mrb[14].mxu0 }
 0x17b   :  { %v1366_v4 = vpop.f32.mrb[15].mxu0 }
 0x17c   :  { %v799_v5 = vpack.c.bf16 %v796_v1, %v795_v0  ;;  %v740_v6 = vadd.f32 %v1364_v2, %v691_v45  ;;  %v1367_v7 = vadd.f32 %v1366_v4, %v1365_v3 }
 0x17e   :  { %v789_v8 = vadd.f32 %v1403_v48, %v740_v6  ;;  %v743_v10 = vadd.f32 %v1367_v7, %v694_v47  ;;  %1421 = vmatprep.mubr.bf16.mxu1 %v799_v5  ;;  %v1280_v47 = vld [vmem:[%s1878_s8] ss:$0 sm:$0xff] }
 0x180   :  { %v792_v11 = vadd.f32 %v1404_v50, %v743_v10  ;;  %v797_v12 = vmax.f32 %v789_v8, 0.0 }
 0x182   :  { %v798_v13 = vmax.f32 %v792_v11, 0.0 }
 0x184   :  { %v800_v15 = vpack.c.bf16 %v798_v13, %v797_v12 }
 0x186   :  { %1422 = vmatmul.mubr.bf16.vlgmr.msra.gmra.mrb[12].mxu1 %v800_v15 }
 0x187   :  { %1446 = vmatpush3.bf16.msra.mxu1 %v1554_v14  ;;  %1461 = vmatprep.mubr.msk.bf16.mxu1 %vm1703_vm1, %v1702_v9 }
 0x188   :  { %1447 = vmatprep.subr.bf16.mxu1 %v1702_v9 }
 0x18b   :  { %1448 = vmatpush3.bf16.msra.mxu1 %v1556_v16 }
 0x18c   :  { %1449 = vmatprep.subr.bf16.mxu1 %v1702_v9 }
 0x18f   :  { %1450 = vmatpush3.bf16.msra.mxu1 %v1558_v17 }
 0x190   :  { %1451 = vmatprep.subr.bf16.mxu1 %v1702_v9 }
 0x193   :  { %1452 = vmatpush3.bf16.msra.mxu1 %v1560_v18 }
 0x194   :  { %1453 = vmatprep.subr.bf16.mxu1 %v1702_v9 }
 0x197   :  { %1454 = vmatpush3.bf16.msra.mxu1 %v1562_v19 }
 0x198   :  { %1455 = vmatprep.subr.bf16.mxu1 %v1702_v9 }
 0x19b   :  { %1456 = vmatpush3.bf16.msra.mxu1 %v1564_v20 }
 0x19c   :  { %1457 = vmatprep.subr.bf16.mxu1 %v1702_v9 }
 0x19f   :  { %1458 = vmatpush3.bf16.msra.mxu1 %v1566_v22 }
 0x1a0   :  { %1459 = vmatprep.subr.bf16.mxu1 %v1702_v9  ;;  %v1279_v9 = vld [vmem:[%s1877_s7] ss:$0 sm:$0xff] }
 0x1a3   :  { %1460 = vmatpush3.bf16.msra.mxu1 %v1568_v24 }
 0x259   :  { %v1423_v25 = vpop.f32.mrb[12].mxu1 }
 0x25a   :  { %v906_v27 = vpop.f32.mrb[13].mxu1  ;;  %v915_v29 = vadd.f32 %v1423_v25, %v1254_v26 }
 0x25b   :  { %v1424_v28 = vpop.f32.mrb[14].mxu1  ;;  %v907_v32 = vadd.f32 %v1254_v26, %v906_v27 }
 0x25c   :  { %v918_v30 = vadd.f32 %v1424_v28, %v1254_v26  ;;  %v909_v31 = vpop.f32.mrb[15].mxu1 }
 0x25d   :  { %v910_v33 = vadd.f32 %v1254_v26, %v909_v31 }
 0x25e   :  { %v922_v34 = vpack.c.bf16 %v918_v30, %v915_v29 }
 0x25f   :  { %v921_v35 = vpack.c.bf16 %v910_v33, %v907_v32 }
 0x260   :  { %1442 = vmatmul.mubr.bf16.vlgmr.msra.gmra.mrb[16].mxu0 %v922_v34 }
 0x261   :  { %1462 = vmatmul.mubr.bf16.vlgmr.msra.gmra.mrb[16].mxu1 %v921_v35 }
 0x333   :  { %v1037_v36 = vpop.f32.mrb[16].mxu0 }
 0x334   :  { %v1443_v37 = vpop.f32.mrb[17].mxu0  ;;  %v1126_v38 = vpop.f32.mrb[16].mxu1 }
 0x335   :  { %v1127_v39 = vadd.f32 %v1126_v38, %v1037_v36  ;;  %v1040_v40 = vpop.f32.mrb[18].mxu0  ;;  %v1463_v41 = vpop.f32.mrb[17].mxu1 }
 0x336   :  { %v1444_v42 = vpop.f32.mrb[19].mxu0  ;;  %v1129_v43 = vpop.f32.mrb[18].mxu1 }
 0x337   :  { %v1130_v44 = vadd.f32 %v1129_v43, %v1040_v40  ;;  %v1464_v45 = vpop.f32.mrb[19].mxu1  ;;  %v1140_v46 = vadd.f32 %v1279_v9, %v1127_v39 }
 0x339   :  { %v1141_v48 = vadd.f32 %v1279_v9, %v1130_v44  ;;  %v1142_v49 = vmax.f32 %v1140_v46, 0.0 }
 0x33b   :  { %v1143_v50 = vmax.f32 %v1141_v48, 0.0  ;;  %v1151_v51 = vmul.f32 %v1280_v47, %v1142_v49 }
 0x33d   :  { %1153 = vadd.xlane.f32.xlu0 %v1151_v51  ;;  %v1152_v52 = vmul.f32 %v1280_v47, %v1143_v50 }
 0x341   :  { %1155 = vadd.xlane.f32.xlu0 %v1152_v52 }
 0x3ca   :  { %v1154_v54 = vpop.xlane.xlu0 %1153 }
 0x3cb   :  { %v1164_v55 = vadd.f32 %v1281_v53, %v1154_v54 }
 0x3cd   :  { %v1282_v56 = vmul.f32 -1.442695, %v1164_v55 }
 0x3ce   :  { %v1156_v57 = vpop.xlane.xlu0 %1155 }
 0x3cf   :  { %1569 = vpow2.f32 %v1282_v56  ;;  %v1165_v58 = vadd.f32 %v1281_v53, %v1156_v57 }
 0x3d1   :  { %v1283_v59 = vmul.f32 -1.442695, %v1165_v58 }
 0x3d3   :  { %1571 = vpow2.f32 %v1283_v59 }
 0x3d9   :  { %v1570_v60 = vpop.eup %1569 }
 0x3da   :  { %v1172_v61 = vadd.f32 1.0, %v1570_v60 }
 0x3dc   :  { %1573 = vrcp.f32 %v1172_v61 }
 0x3dd   :  { %v1572_v62 = vpop.eup %1571 }
 0x3de   :  { %v1173_v63 = vadd.f32 1.0, %v1572_v62 }
 0x3e0   :  { %1575 = vrcp.f32 %v1173_v63 }
 0x3e6   :  { %v1574_v0 = vpop.eup %1573 }
 0x3e7   :  { %1179 = vst.msk [vmem:[%s1880_s10] sm:$0xff] %vm1178_vm2, %v1574_v0 }
 0x3ea   :  { %v1576_v1 = vpop.eup %1575 }
 0x3eb   :  { %1180 = vst.msk [vmem:[%s1880_s10 + $0x8] sm:$0xff] %vm1178_vm2, %v1576_v1 }
 0x3ec   :  { %1185 = vsyncpa [#allocation4], 1 }
 0x3ed   :  { %1186 = vsyncpa [#allocation6], 1 }
 0x3ee   :  { %1187 = vsyncpa [#allocation9], 1 }

</bundles_post_ra>
